<compile_context>
chip_gen: v7x
topology: tpu7x:2x2x1
jax: 0.10.0
libtpu: 0.0.40
codegen_flags: <defaults>
</compile_context>

<pallas_src>
import jax
import jax.numpy as jnp
from jax.experimental import pallas as pl
from jax.experimental.pallas import tpu as pltpu

GAMMA = 2.0   # deterministic "parameters" of the module
ALPHA = 0.25

LANES = 128
MAX_TILE_ROWS = 2048  # 1 MiB f32 tile; safe for v5e 16 MiB scoped-VMEM default


def _stable_bce_terms(x, t):
    """Returns (bce, e=exp(-|x|)) with the numerically stable torch formula."""
    e = jnp.exp(-jnp.abs(x))                               # 1 EUP op, reused below
    bce = jnp.maximum(x, 0.0) - x * t + jnp.log(1.0 + e)   # 1 EUP op
    return bce, e


# ---- Fused pass: BCE global sum (resident accumulator) + focal-weight map ---
def fused_kernel(n_ref, x_ref, t_ref, w_ref, psum_ref):
    i = pl.program_id(0)
    nsteps = pl.num_programs(0)
    tile_rows = x_ref.shape[0]

    @pl.when(i == 0)
    def _():
        psum_ref[...] = jnp.zeros_like(psum_ref)

    x = x_ref[...].astype(jnp.float32)
    t = t_ref[...].astype(jnp.float32)

    bce, e = _stable_bce_terms(x, t)

    # Keep the accumulator vreg-shaped: (T,128) -> (T//8, 8, 128) -> sum over the
    # leading axis is pure VPU adds; the only cross-lane reduce is done in JAX glue.
    @pl.when(i < nsteps - 1)
    def _():
        psum_ref[...] += bce.reshape(-1, 8, LANES).sum(axis=0)

    @pl.when(i == nsteps - 1)
    def _():
        # Mask the tail of the (possibly partial) last tile: both the <128-element
        # reshape pad and any Pallas out-of-bounds garbage rows get zeroed, so the
        # scalar mean uses exactly the n real elements.
        row = jax.lax.broadcasted_iota(jnp.int32, (tile_rows, LANES), 0)
        lane = jax.lax.broadcasted_iota(jnp.int32, (tile_rows, LANES), 1)
        gidx = (i * tile_rows + row) * LANES + lane
        bce_m = jnp.where(gidx < n_ref[0], bce, 0.0)
        psum_ref[...] += bce_m.reshape(-1, 8, LANES).sum(axis=0)

    # Mean-independent focal weight: gamma * (1 - p_t) * alpha_t.
    # sigmoid derived from the same e: r = 1/(1+e); probs = r (x>=0) else e*r.
    r = 1.0 / (1.0 + e)                                    # 1 EUP op (exact)
    probs = jnp.where(x >= 0.0, r, e * r)
    p_t = probs * t + (1.0 - probs) * (1.0 - t)            # general (soft-target-safe) form
    alpha_t = ALPHA * t + (1.0 - ALPHA) * (1.0 - t)
    w_ref[...] = (GAMMA * (1.0 - p_t)) * alpha_t
    # Tail rows of w are garbage; the wrapper slices them off before use.


# ---------------- Wrapper ----------------------------------------------------
def focal_loss(inputs, targets):
    orig_shape = inputs.shape
    orig_dtype = inputs.dtype
    n = inputs.size

    x = inputs.reshape(-1)
    t = targets.reshape(-1)

    rows = pl.cdiv(n, LANES)
    pad = rows * LANES - n
    if pad:
        # Only needed when n % 128 != 0 (2-D lane layout requires it); at most 127
        # elements, and the in-kernel mask makes the pad value irrelevant.
        x = jnp.pad(x, (0, pad))
        t = jnp.pad(t, (0, pad))

    x2d = x.reshape(rows, LANES)
    t2d = t.reshape(rows, LANES)

    tile_rows = min(MAX_TILE_ROWS, ((rows + 7) // 8) * 8)   # sublane-aligned tile
    steps = pl.cdiv(rows, tile_rows)                        # partial last tile OK (masked)

    n_arr = jnp.array([n], dtype=jnp.int32)                 # scalar-prefetched to SMEM

    w2d, psum = pl.pallas_call(
        fused_kernel,
        out_shape=(
            jax.ShapeDtypeStruct((rows, LANES), jnp.float32),   # focal weight map
            jax.ShapeDtypeStruct((8, LANES), jnp.float32),      # vreg-shaped BCE partial sums
        ),
        grid_spec=pltpu.PrefetchScalarGridSpec(
            num_scalar_prefetch=1,
            grid=(steps,),
            in_specs=[
                pl.BlockSpec((tile_rows, LANES), lambda i, n_ref: (i, 0)),
                pl.BlockSpec((tile_rows, LANES), lambda i, n_ref: (i, 0)),
            ],
            out_specs=[
                pl.BlockSpec((tile_rows, LANES), lambda i, n_ref: (i, 0)),
                pl.BlockSpec((8, LANES), lambda i, n_ref: (0, 0)),  # resident accumulator
            ],
        ),
        compiler_params=pltpu.CompilerParams(
            dimension_semantics=("arbitrary",)),
    )(n_arr, x2d, t2d)

    # Scalar glue in plain JAX: mean over the *real* element count.
    mean_bce = jnp.sum(psum) / jnp.float32(n)

    # XLA fuses the scalar multiply with the de-pad slice -> no extra HBM round trip.
    loss = (w2d.reshape(-1)[:n] * mean_bce).reshape(orig_shape)
    return loss.astype(orig_dtype)


# ---------------- Pure-JAX reference (for verification) ---------------------
def focal_loss_ref(inputs, targets):
    x = inputs.astype(jnp.float32)
    t = targets.astype(jnp.float32)
    probs = jax.nn.sigmoid(x)
    bce = jnp.mean(jnp.maximum(x, 0.0) - x * t + jnp.log(1.0 + jnp.exp(-jnp.abs(x))))
    p_t = probs * t + (1.0 - probs) * (1.0 - t)
    focal_weight = (1.0 - p_t) * GAMMA
    alpha_t = ALPHA * t + (1.0 - ALPHA) * (1.0 - t)
    return (focal_weight * (alpha_t * bce)).astype(inputs.dtype)


if __name__ == "__main__":
    key = jax.random.PRNGKey(0)
    k1, k2 = jax.random.split(key)
    # logits and binary targets, NCHW layout like the PyTorch module would see
    inputs = jax.random.normal(k1, (2, 4, 16, 16), dtype=jnp.float32)
    targets = jax.random.bernoulli(k2, p=0.5, shape=(2, 4, 16, 16)).astype(jnp.float32)

    out = focal_loss(inputs, targets)
    out = jax.block_until_ready(out)

    ref = focal_loss_ref(inputs, targets)
    assert out.shape == inputs.shape and out.dtype == jnp.float32
    assert jnp.allclose(out, ref, rtol=1e-5, atol=1e-5), "mismatch vs reference"

    print("KERNEL_OK")
</pallas_src>

<mosaic_0001>
module attributes {stable_mosaic.version = 11 : i64} {
  func.func @fused_kernel(%arg0: i32, %arg1: memref<1xi32, #tpu.memory_space<smem>>, %arg2: memref<16x128xf32, #tpu.memory_space<vmem>>, %arg3: memref<16x128xf32, #tpu.memory_space<vmem>>, %arg4: memref<16x128xf32, #tpu.memory_space<vmem>>, %arg5: memref<8x128xf32, #tpu.memory_space<vmem>>) attributes {dimension_semantics = [#tpu.dimension_semantics<arbitrary>], iteration_bounds = array<i64: 1>, scalar_prefetch = 1 : i64, scratch_operands = 0 : i64, tpu.core_type = #tpu.core_type<tc>, window_params = [{transform_indices = @transform_0, window_bounds = array<i64: 16, 128>}, {transform_indices = @transform_1, window_bounds = array<i64: 16, 128>}, {transform_indices = @transform_2, window_bounds = array<i64: 16, 128>}, {pipeline_mode = #tpu.pipeline_mode<synchronous>, transform_indices = @transform_3, window_bounds = array<i64: 8, 128>}]} {
    %c0_i32 = arith.constant 0 : i32
    %0 = arith.cmpi eq, %arg0, %c0_i32 : i32
    %1 = arith.extui %0 : i1 to i32
    %c0_i32_0 = arith.constant 0 : i32
    %2 = arith.cmpi ne, %1, %c0_i32_0 : i32
    scf.if %2 {
      %cst_22 = arith.constant 0.000000e+00 : f32
      %51 = vector.broadcast %cst_22 : f32 to vector<8x128xf32>
      %c0_23 = arith.constant 0 : index
      %c0_24 = arith.constant 0 : index
      %52 = vector.load %arg5[%c0_23, %c0_24] : memref<8x128xf32, #tpu.memory_space<vmem>>, vector<8x128xf32>
      tpu.vector_store %arg5[%c0_23, %c0_24], %51 {strides = array<i32>} : memref<8x128xf32, #tpu.memory_space<vmem>>, vector<8x128xf32>,
    } else {
    }
    %c0 = arith.constant 0 : index
    %c0_1 = arith.constant 0 : index
    %3 = vector.load %arg2[%c0, %c0_1] : memref<16x128xf32, #tpu.memory_space<vmem>>, vector<16x128xf32>
    %c0_2 = arith.constant 0 : index
    %c0_3 = arith.constant 0 : index
    %4 = vector.load %arg3[%c0_2, %c0_3] : memref<16x128xf32, #tpu.memory_space<vmem>>, vector<16x128xf32>
    %5 = math.absf %3 : vector<16x128xf32>
    %cst = arith.constant 0.000000e+00 : f32
    %6 = vector.broadcast %cst : f32 to vector<16x128xf32>
    %7 = arith.subf %6, %5 : vector<16x128xf32>
    %8 = math.exp %7 : vector<16x128xf32>
    %cst_4 = arith.constant 0.000000e+00 : f32
    %9 = vector.broadcast %cst_4 : f32 to vector<16x128xf32>
    %10 = arith.maximumf %3, %9 : vector<16x128xf32>
    %11 = arith.mulf %3, %4 : vector<16x128xf32>
    %12 = arith.subf %10, %11 : vector<16x128xf32>
    %cst_5 = arith.constant 1.000000e+00 : f32
    %13 = vector.broadcast %cst_5 : f32 to vector<16x128xf32>
    %14 = arith.addf %13, %8 : vector<16x128xf32>
    %15 = math.log %14 : vector<16x128xf32>
    %16 = arith.addf %12, %15 : vector<16x128xf32>
    %c0_i32_6 = arith.constant 0 : i32
    %17 = arith.cmpi slt, %arg0, %c0_i32_6 : i32
    %18 = arith.extui %17 : i1 to i32
    %c0_i32_7 = arith.constant 0 : i32
    %19 = arith.cmpi ne, %18, %c0_i32_7 : i32
    scf.if %19 {
      %c0_22 = arith.constant 0 : index
      %c0_23 = arith.constant 0 : index
      %51 = vector.load %arg5[%c0_22, %c0_23] : memref<8x128xf32, #tpu.memory_space<vmem>>, vector<8x128xf32>
      %52 = vector.shape_cast %16 : vector<16x128xf32> to vector<2x8x128xf32>
      %cst_24 = arith.constant dense<0.000000e+00> : vector<8x128xf32>
      %53 = vector.multi_reduction <add>, %52, %cst_24 [0] : vector<2x8x128xf32> to vector<8x128xf32>
      %54 = arith.addf %51, %53 : vector<8x128xf32>
      %c0_25 = arith.constant 0 : index
      %c0_26 = arith.constant 0 : index
      %55 = vector.load %arg5[%c0_25, %c0_26] : memref<8x128xf32, #tpu.memory_space<vmem>>, vector<8x128xf32>
      tpu.vector_store %arg5[%c0_25, %c0_26], %54 {strides = array<i32>} : memref<8x128xf32, #tpu.memory_space<vmem>>, vector<8x128xf32>,
    } else {
    }
    %c0_i32_8 = arith.constant 0 : i32
    %20 = arith.cmpi eq, %arg0, %c0_i32_8 : i32
    %21 = arith.extui %20 : i1 to i32
    %c0_i32_9 = arith.constant 0 : i32
    %22 = arith.cmpi ne, %21, %c0_i32_9 : i32
    scf.if %22 {
      %51 = tpu.iota {dimensions = array<i32: 0>} : vector<16x128xi32>
      %52 = tpu.iota {dimensions = array<i32: 1>} : vector<16x128xi32>
      %c16_i32 = arith.constant 16 : i32
      %53 = arith.muli %arg0, %c16_i32 : i32
      %54 = vector.broadcast %53 : i32 to vector<16x128xi32>
      %55 = arith.addi %54, %51 : vector<16x128xi32>
      %c128_i32 = arith.constant 128 : i32
      %56 = vector.broadcast %c128_i32 : i32 to vector<16x128xi32>
      %57 = arith.muli %55, %56 : vector<16x128xi32>
      %58 = arith.addi %57, %52 : vector<16x128xi32>
      %c0_22 = arith.constant 0 : index
      %59 = memref.load %arg1[%c0_22] : memref<1xi32, #tpu.memory_space<smem>>
      %60 = vector.broadcast %59 : i32 to vector<16x128xi32>
      %61 = arith.cmpi slt, %58, %60 : vector<16x128xi32>
      %cst_23 = arith.constant 0.000000e+00 : f32
      %62 = vector.broadcast %cst_23 : f32 to vector<16x128xf32>
      %63 = arith.select %61, %16, %62 : vector<16x128xi1>, vector<16x128xf32>
      %c0_24 = arith.constant 0 : index
      %c0_25 = arith.constant 0 : index
      %64 = vector.load %arg5[%c0_24, %c0_25] : memref<8x128xf32, #tpu.memory_space<vmem>>, vector<8x128xf32>
      %65 = vector.shape_cast %63 : vector<16x128xf32> to vector<2x8x128xf32>
      %cst_26 = arith.constant dense<0.000000e+00> : vector<8x128xf32>
      %66 = vector.multi_reduction <add>, %65, %cst_26 [0] : vector<2x8x128xf32> to vector<8x128xf32>
      %67 = arith.addf %64, %66 : vector<8x128xf32>
      %c0_27 = arith.constant 0 : index
      %c0_28 = arith.constant 0 : index
      %68 = vector.load %arg5[%c0_27, %c0_28] : memref<8x128xf32, #tpu.memory_space<vmem>>, vector<8x128xf32>
      tpu.vector_store %arg5[%c0_27, %c0_28], %67 {strides = array<i32>} : memref<8x128xf32, #tpu.memory_space<vmem>>, vector<8x128xf32>,
    } else {
    }
    %cst_10 = arith.constant 1.000000e+00 : f32
    %23 = vector.broadcast %cst_10 : f32 to vector<16x128xf32>
    %24 = arith.addf %23, %8 : vector<16x128xf32>
    %cst_11 = arith.constant 1.000000e+00 : f32
    %25 = vector.broadcast %cst_11 : f32 to vector<16x128xf32>
    %26 = arith.divf %25, %24 : vector<16x128xf32>
    %cst_12 = arith.constant 0.000000e+00 : f32
    %27 = vector.broadcast %cst_12 : f32 to vector<16x128xf32>
    %28 = arith.cmpf oge, %3, %27 : vector<16x128xf32>
    %29 = arith.mulf %8, %26 : vector<16x128xf32>
    %30 = arith.select %28, %26, %29 : vector<16x128xi1>, vector<16x128xf32>
    %31 = arith.mulf %30, %4 : vector<16x128xf32>
    %cst_13 = arith.constant 1.000000e+00 : f32
    %32 = vector.broadcast %cst_13 : f32 to vector<16x128xf32>
    %33 = arith.subf %32, %30 : vector<16x128xf32>
    %cst_14 = arith.constant 1.000000e+00 : f32
    %34 = vector.broadcast %cst_14 : f32 to vector<16x128xf32>
    %35 = arith.subf %34, %4 : vector<16x128xf32>
    %36 = arith.mulf %33, %35 : vector<16x128xf32>
    %37 = arith.addf %31, %36 : vector<16x128xf32>
    %cst_15 = arith.constant 2.500000e-01 : f32
    %38 = vector.broadcast %cst_15 : f32 to vector<16x128xf32>
    %39 = arith.mulf %38, %4 : vector<16x128xf32>
    %cst_16 = arith.constant 1.000000e+00 : f32
    %40 = vector.broadcast %cst_16 : f32 to vector<16x128xf32>
    %41 = arith.subf %40, %4 : vector<16x128xf32>
    %cst_17 = arith.constant 7.500000e-01 : f32
    %42 = vector.broadcast %cst_17 : f32 to vector<16x128xf32>
    %43 = arith.mulf %42, %41 : vector<16x128xf32>
    %44 = arith.addf %39, %43 : vector<16x128xf32>
    %cst_18 = arith.constant 1.000000e+00 : f32
    %45 = vector.broadcast %cst_18 : f32 to vector<16x128xf32>
    %46 = arith.subf %45, %37 : vector<16x128xf32>
    %cst_19 = arith.constant 2.000000e+00 : f32
    %47 = vector.broadcast %cst_19 : f32 to vector<16x128xf32>
    %48 = arith.mulf %47, %46 : vector<16x128xf32>
    %49 = arith.mulf %48, %44 : vector<16x128xf32>
    %c0_20 = arith.constant 0 : index
    %c0_21 = arith.constant 0 : index
    %50 = vector.load %arg4[%c0_20, %c0_21] : memref<16x128xf32, #tpu.memory_space<vmem>>, vector<16x128xf32>
    tpu.vector_store %arg4[%c0_20, %c0_21], %49 {strides = array<i32>} : memref<16x128xf32, #tpu.memory_space<vmem>>, vector<16x128xf32>,
    return
  }
  func.func @transform_0(%arg0: i32, %arg1: memref<1xi32, #tpu.memory_space<smem>>) -> (i32, i32) {
    %c0_i32 = arith.constant 0 : i32
    %c0_i32_0 = arith.constant 0 : i32
    return %arg0, %c0_i32 : i32, i32
  }
  func.func @transform_1(%arg0: i32, %arg1: memref<1xi32, #tpu.memory_space<smem>>) -> (i32, i32) {
    %c0_i32 = arith.constant 0 : i32
    %c0_i32_0 = arith.constant 0 : i32
    return %arg0, %c0_i32 : i32, i32
  }
  func.func @transform_2(%arg0: i32, %arg1: memref<1xi32, #tpu.memory_space<smem>>) -> (i32, i32) {
    %c0_i32 = arith.constant 0 : i32
    %c0_i32_0 = arith.constant 0 : i32
    return %arg0, %c0_i32 : i32, i32
  }
  func.func @transform_3(%arg0: i32, %arg1: memref<1xi32, #tpu.memory_space<smem>>) -> (i32, i32) {
    %c0_i32 = arith.constant 0 : i32
    %c0_i32_0 = arith.constant 0 : i32
    %c0_i32_1 = arith.constant 0 : i32
    return %c0_i32, %c0_i32_0 : i32, i32
  }
}

</mosaic_0001>

<bundles_post_ra>
// kernel: tpu_custom_call.1
= control target key start
LH: loop header
LB: loop body
LE: loop exit
PB: predicated region body
PF: predicated region fallthrough
CT: control target
= control target key end

     0   :  { %11 = vsyncpa [#allocation5], 0  ;;  %s388_s0 = inlined_call_operand.<no memory space> [shape: s32[1], index: 0, kind: input, shape index: {}]   ;;  %s389_s1 = inlined_call_operand.hbm [shape: f32[16,128], index: 1, kind: input, shape index: {}]   ;;  %s390_s2 = inlined_call_operand.hbm [shape: f32[16,128], index: 2, kind: input, shape index: {}]   ;;  %s391_s3 = inlined_call_operand.hbm [shape: f32[16,128], index: 3, kind: output, shape index: {0}]   ;;  %s392_s4 = inlined_call_operand.hbm [shape: f32[8,128], index: 4, kind: output, shape index: {1}]  }
   0x1   :  { %12 = vsyncpa [#allocation8], 0 }
   0x2   :  { %13 = vsyncpa [#allocation6], 0 }
   0x3   :  { %14 = vsyncpa [#allocation11], 0  ;;  %s291_s15 = smov [#allocation4]   ;;  %s195_s19 = scalar_lea.hbm %s389_s1, 256 }
   0x4   :  { %s20_s16 = sshll.u32 %s291_s15, 4  ;;  %p196_p0 = scmp.ne.s32.totalorder %s389_s1, %s195_s19  ;;  %s21_s16 = int_to_ptr.vmem [resolvable:$true] %s20_s16 }
   0x5   :  { %p199_p1 = scmp.lt.u32.totalorder %s195_s19, %s389_s1 }
   0x7   :  { %p201_p2 = pnand %p199_p1, %p196_p0 }
   0x9   :  { %204 = shalt.err (!%p201_p2)
}
   0xa   :  { %s205_s24 = scalar_lea.vmem %s21_s16, 256  ;;  %p210_p4 = scmp.lt.s32.totalorder %s21_s16, %s21_s16 }
   0xb   :  { %p206_p3 = scmp.ne.s32.totalorder %s21_s16, %s205_s24  ;;  %p211_p5 = scmp.lt.s32.totalorder %s205_s24, %s205_s24 }
   0xd   :  { %p212_p6 = por %p211_p5, %p210_p4 }
   0xf   :  { %p213_p7 = pnand %p212_p6, %p206_p3 }
  0x11   :  { %216 = shalt.err (!%p213_p7)
}
  0x12   :  { %s292_s25 = smov 128   ;;  %s293_s26 = smov 8  }
  0x13   :  { %26 = dma.hbm_to_vmem [thread:$0]  %s389_s1, 256, %s21_s16, [#allocation5], %s292_s25, %s292_s25, %s293_s26  }
  0x14   :  { %s294_s29 = smov [#allocation7]   ;;  %s217_s7 = scalar_lea.hbm %s390_s2, 256 }
  0x15   :  { %s32_s30 = sshll.u32 %s294_s29, 4  ;;  %p218_p8 = scmp.ne.s32.totalorder %s390_s2, %s217_s7  ;;  %s33_s30 = int_to_ptr.vmem [resolvable:$true] %s32_s30 }
  0x16   :  { %p221_p9 = scmp.lt.u32.totalorder %s217_s7, %s390_s2 }
  0x18   :  { %p223_p10 = pnand %p221_p9, %p218_p8 }
  0x1a   :  { %226 = shalt.err (!%p223_p10)
}
  0x1b   :  { %s227_s12 = scalar_lea.vmem %s33_s30, 256  ;;  %p232_p12 = scmp.lt.s32.totalorder %s33_s30, %s33_s30 }
  0x1c   :  { %p228_p11 = scmp.ne.s32.totalorder %s33_s30, %s227_s12  ;;  %p233_p13 = scmp.lt.s32.totalorder %s227_s12, %s227_s12 }
  0x1e   :  { %p234_p0 = por %p233_p13, %p232_p12 }
  0x20   :  { %p235_p1 = pnand %p234_p0, %p228_p11 }
  0x22   :  { %238 = shalt.err (!%p235_p1)
}
  0x23   :  { %38 = dma.hbm_to_vmem [thread:$0]  %s390_s2, 256, %s33_s30, [#allocation8], %s292_s25, %s292_s25, %s293_s26  }
  0x24   :  { %283 = dma.done.wait [#allocation5], 256  }
  0x25   :  { %284 = vsyncadd [#allocation5], 4294967040 }
  0x26   :  { %285 = dma.done.wait [#allocation8], 256  }
  0x27   :  { %286 = vsyncadd [#allocation8], 4294967040  ;;  %v50_v0 = vld [vmem:[#allocation4] sm:$0xff]  ;;  %v51_v1 = vld [vmem:[#allocation4 + $0x8] sm:$0xff]  ;;  %v87_v8 = vlaneseq  ;;  %v101_v27 = vstv %s388_s0  ;;  %s295_s0 = smov [#allocation10]  }
  0x28   :  { %v54_v2 = vand.u32 2147483647, %v50_v0  ;;  %v55_v3 = vand.u32 2147483647, %v51_v1  ;;  %v52_v15 = vld [vmem:[#allocation7] sm:$0xff]  ;;  %v53_v16 = vld [vmem:[#allocation7 + $0x8] sm:$0xff] }
  0x29   :  { %v88_v10 = vshrl.u32 %v87_v8, 7  ;;  %v91_v17 = vand.u32 127, %v87_v8  ;;  %v62_v19 = vmax.f32 %v50_v0, 0.0  ;;  %v64_v20 = vmul.f32 %v52_v15, %v50_v0  ;;  %s162_s15 = sshll.u32 %s295_s0, 4  ;;  %s163_s15 = int_to_ptr.vmem [resolvable:$true] %s162_s15 }
  0x2a   :  { %v56_v4 = vsub.f32 0.0, %v54_v2  ;;  %v57_v5 = vsub.f32 0.0, %v55_v3  ;;  %v63_v22 = vmax.f32 %v51_v1, 0.0  ;;  %v65_v23 = vmul.f32 %v53_v16, %v51_v1  ;;  %s239_s16 = scalar_lea.vmem %s163_s15, 128  ;;  %p244_p3 = scmp.lt.s32.totalorder %s163_s15, %s163_s15 }
  0x2b   :  { %v89_v14 = vadd.s32 8, %v88_v10  ;;  %v96_v18 = vmul.u32 128, %v88_v10  ;;  %v66_v25 = vsub.f32 %v62_v19, %v64_v20  ;;  %vm114_vm1 = vcmp.ge.f32.partialorder %v50_v0, 0.0  ;;  %p240_p2 = scmp.ne.s32.totalorder %s163_s15, %s239_s16  ;;  %p245_p4 = scmp.lt.s32.totalorder %s239_s16, %s239_s16 }
  0x2c   :  { %v58_v6 = vmul.f32 1.442695, %v56_v4  ;;  %v60_v7 = vmul.f32 1.442695, %v57_v5  ;;  %v67_v29 = vsub.f32 %v63_v22, %v65_v23  ;;  %vm115_vm3 = vcmp.ge.f32.partialorder %v51_v1, 0.0 }
  0x2d   :  { %v97_v21 = vmul.u32 128, %v89_v14  ;;  %v98_v24 = vadd.s32 %v96_v18, %v91_v17  ;;  %v124_v39 = vsub.f32 1.0, %v52_v15  ;;  %v125_v43 = vsub.f32 1.0, %v53_v16  ;;  %p246_p5 = por %p245_p4, %p244_p3 }
  0x2e   :  { %183 = vpow2.f32 %v58_v6  ;;  %v130_v52 = vmul.f32 0.25, %v52_v15  ;;  %v131_v55 = vmul.f32 0.25, %v53_v16 }
  0x2f   :  { %185 = vpow2.f32 %v60_v7  ;;  %v99_v26 = vadd.s32 %v97_v21, %v91_v17  ;;  %vm355_vm0 = vcmp.lt.s32.totalorder %v98_v24, %v101_v27  ;;  %v132_v53 = vmul.f32 0.75, %v124_v39  ;;  %p247_p6 = pnand %p246_p5, %p240_p2 }
  0x30   :  { %v133_v56 = vmul.f32 0.75, %v125_v43 }
  0x31   :  { %vm103_vm2 = vcmp.lt.s32.totalorder %v99_v26, %v101_v27  ;;  %v134_v59 = vadd.f32 %v132_v53, %v130_v52 }
  0x38   :  { %v184_v9 = vpop.eup %183 }
  0x39   :  { %v186_v11 = vpop.eup %185  ;;  %v68_v12 = vadd.f32 1.0, %v184_v9 }
  0x3a   :  { %v69_v13 = vadd.f32 1.0, %v186_v11 }
  0x3b   :  { %187 = vlog2.f32 %v68_v12 }
  0x3c   :  { %189 = vlog2.f32 %v69_v13 }
  0x3d   :  { %191 = vrcp.f32 %v68_v12 }
  0x3e   :  { %193 = vrcp.f32 %v69_v13 }
  0x45   :  { %v188_v28 = vpop.eup %187 }
  0x46   :  { %v190_v30 = vpop.eup %189  ;;  %v71_v31 = vmul.f32 0.6931472, %v188_v28 }
  0x47   :  { %v192_v32 = vpop.eup %191  ;;  %v73_v33 = vmul.f32 0.6931472, %v190_v30 }
  0x48   :  { %v194_v35 = vpop.eup %193  ;;  %v74_v36 = vadd.f32 %v71_v31, %v66_v25  ;;  %v116_v37 = vmul.f32 %v192_v32, %v184_v9 }
  0x49   :  { %v75_v38 = vadd.f32 %v73_v33, %v67_v29  ;;  %v117_v40 = vmul.f32 %v194_v35, %v186_v11 }
  0x4a   :  { %v104_v41 = vsel %vm355_vm0, %v74_v36, 0.0  ;;  %v118_v42 = vsel %vm114_vm1, %v192_v32, %v116_v37 }
  0x4b   :  { %v105_v44 = vsel %vm103_vm2, %v75_v38, 0.0  ;;  %v120_v45 = vmul.f32 %v118_v42, %v52_v15  ;;  %v122_v46 = vsub.f32 1.0, %v118_v42  ;;  %v119_v47 = vsel %vm115_vm3, %v194_v35, %v117_v40 }
  0x4c   :  { %v107_v48 = vadd.f32 %v105_v44, %v104_v41  ;;  %v121_v49 = vmul.f32 %v119_v47, %v53_v16  ;;  %v123_v50 = vsub.f32 1.0, %v119_v47 }
  0x4d   :  { %v126_v51 = vmul.f32 %v124_v39, %v122_v46 }
  0x4e   :  { %v127_v54 = vmul.f32 %v125_v43, %v123_v50  ;;  %109 = vst [vmem:[#allocation10] sm:$0xff] %v107_v48 }
  0x4f   :  { %v128_v57 = vadd.f32 %v126_v51, %v120_v45 }
  0x50   :  { %v129_v58 = vadd.f32 %v127_v54, %v121_v49 }
  0x51   :  { %v136_v60 = vsub.f32 1.0, %v128_v57 }
  0x52   :  { %250 = shalt.err (!%p247_p6)
}
  0x53   :  { %s251_s19 = scalar_lea.hbm %s392_s4, 128 }
  0x54   :  { %p252_p7 = scmp.ne.s32.totalorder %s392_s4, %s251_s19  ;;  %p255_p8 = scmp.lt.u32.totalorder %s251_s19, %s392_s4 }
  0x56   :  { %p257_p9 = pnand %p255_p8, %p252_p7 }
  0x58   :  { %260 = shalt.err (!%p257_p9)
}
  0x59   :  { %165 = dma.vmem_to_hbm [thread:$0]  %s163_s15, 128, %s392_s4, [#allocation11]   ;;  %v135_v61 = vadd.f32 %v133_v56, %v131_v55  ;;  %v137_v62 = vsub.f32 1.0, %v129_v58  ;;  %v138_v63 = vmul.f32 2.0, %v136_v60 }
  0x5a   :  { %s296_s28 = smov [#allocation9]  }
  0x5b   :  { %s149_s29 = sshll.u32 %s296_s28, 4  ;;  %v139_v0 = vmul.f32 2.0, %v137_v62  ;;  %v140_v1 = vmul.f32 %v138_v63, %v134_v59  ;;  %s150_s29 = int_to_ptr.vmem [resolvable:$true] %s149_s29 }
  0x5c   :  { %s261_s30 = scalar_lea.vmem %s150_s29, 256  ;;  %p266_p11 = scmp.lt.s32.totalorder %s150_s29, %s150_s29 }
  0x5d   :  { %v141_v2 = vmul.f32 %v139_v0, %v135_v61  ;;  %142 = vst [vmem:[#allocation9] sm:$0xff] %v140_v1  ;;  %p262_p10 = scmp.ne.s32.totalorder %s150_s29, %s261_s30  ;;  %p267_p12 = scmp.lt.s32.totalorder %s261_s30, %s261_s30 }
  0x5f   :  { %143 = vst [vmem:[#allocation9 + $0x8] sm:$0xff] %v141_v2  ;;  %p268_p13 = por %p267_p12, %p266_p11 }
  0x61   :  { %p269_p0 = pnand %p268_p13, %p262_p10 }
  0x63   :  { %272 = shalt.err (!%p269_p0)
}
  0x64   :  { %s273_s6 = scalar_lea.hbm %s391_s3, 256 }
  0x65   :  { %p274_p1 = scmp.ne.s32.totalorder %s391_s3, %s273_s6  ;;  %p277_p2 = scmp.lt.u32.totalorder %s273_s6, %s391_s3 }
  0x67   :  { %p279_p3 = pnand %p277_p2, %p274_p1 }
  0x69   :  { %282 = shalt.err (!%p279_p3)
}
  0x6a   :  { %155 = dma.vmem_to_hbm [thread:$0]  %s150_s29, 256, %s391_s3, [#allocation6], %s292_s25, %s292_s25, %s293_s26  }
  0x6b   :  { %287 = dma.done.wait [#allocation6], 256  }
  0x6c   :  { %288 = vsyncadd [#allocation6], 4294967040 }
  0x6d   :  { %289 = dma.done.wait [#allocation11], 128  }
  0x6e   :  { %290 = vsyncadd [#allocation11], 4294967168 }
  0x6f   :  { %172 = vsyncpa [#allocation5], 1 }
  0x70   :  { %173 = vsyncpa [#allocation8], 1 }
  0x71   :  { %174 = vsyncpa [#allocation6], 1 }
  0x72   :  { %175 = vsyncpa [#allocation11], 1 }

</bundles_post_ra>
